<compile_context>
chip_gen: v6e
topology: v6e:2x2x1
jax: 0.10.0
libtpu: 0.0.40
codegen_flags: <defaults>
</compile_context>

<pallas_src>
import functools

import jax
import jax.numpy as jnp
from jax import lax
from jax.experimental import pallas as pl
from jax.experimental.pallas import tpu as pltpu


def _mat_logreg_kernel(a_ref, w_ref, c_ref, o_ref, *, tile_b, batch):
    # logits tile = A_tile @ W   (bf16 x bf16 -> f32 accumulation on the MXU)
    logits = jnp.dot(a_ref[...], w_ref[...], preferred_element_type=jnp.float32)

    # Numerically stable softplus(-C * logits), all in f32 on the VPU/EUP:
    #   softplus(z) = max(z, 0) + log1p(exp(-|z|))
    z = -c_ref[...] * logits
    sp = jnp.maximum(z, 0.0) + jnp.log1p(jnp.exp(-jnp.abs(z)))

    # Mask off padded rows on the (possibly ragged) last batch tile.
    if batch % tile_b != 0:
        row = pl.program_id(0) * tile_b + lax.broadcasted_iota(
            jnp.int32, sp.shape, 0
        )
        sp = jnp.where(row < batch, sp, 0.0)

    # Per-tile partial sum over the batch (sublane) axis -> one (1, q) row.
    # Cross-lane / final reduction happens once in the wrapper.
    o_ref[...] = jnp.sum(sp, axis=0, keepdims=True)


def _choose_batch_tile(batch, m, q):
    """Pick a batch tile that fits conservatively in scoped VMEM on all gens."""
    # Budget only the streamed, double-buffered inputs (A tile bf16, C tile f32).
    budget_bytes = 8 * 1024 * 1024  # safe vs v5e 16 MiB default scope, v7x 64 MiB
    per_row_bytes = 2 * (m * 2 + q * 4)  # x2 for pipeline double-buffering
    cap = max(8, budget_bytes // max(per_row_bytes, 1))
    if batch <= min(512, cap):
        return batch  # single tile uses full (non-padded) batch dim
    tb = min(512, cap)
    return max(8, (tb // 8) * 8)  # keep sublane (8) alignment


def matrix_logistic_regression(A_batch, X, B, C_batch, tile_batch=None):
    """sum(softplus(-C_batch * (A_batch @ X @ B))) with a Pallas TPU kernel."""
    batch, m = A_batch.shape
    n, q = B.shape
    assert X.shape == (m, n)
    assert C_batch.shape == (batch, q)

    # Hoist the batch-invariant matmul: W = X @ B (f32 once, then bf16 for MXU).
    W = jnp.dot(
        X.astype(jnp.float32), B.astype(jnp.float32),
        preferred_element_type=jnp.float32,
    ).astype(jnp.bfloat16)
    A_bf = A_batch.astype(jnp.bfloat16)   # halves streamed HBM traffic for A
    C_f = C_batch.astype(jnp.float32)

    tb = tile_batch if tile_batch is not None else _choose_batch_tile(batch, m, q)
    tb = min(tb, batch)
    if tb != batch and tb % 8 != 0:
        tb = max(8, (tb // 8) * 8)  # block first dim must be x8 unless full dim
    num_tiles = pl.cdiv(batch, tb)

    kernel = functools.partial(_mat_logreg_kernel, tile_b=tb, batch=batch)

    partials = pl.pallas_call(
        kernel,
        out_shape=jax.ShapeDtypeStruct((num_tiles, q), jnp.float32),
        grid_spec=pltpu.PrefetchScalarGridSpec(
            num_scalar_prefetch=0,
            grid=(num_tiles,),
            in_specs=[
                pl.BlockSpec((tb, m), lambda i: (i, 0)),   # streamed A tile
                pl.BlockSpec((m, q), lambda i: (0, 0)),    # VMEM-resident W
                pl.BlockSpec((tb, q), lambda i: (i, 0)),   # streamed C tile
            ],
            out_specs=pl.BlockSpec((1, q), lambda i: (i, 0)),  # per-tile partials
        ),
        compiler_params=pltpu.CompilerParams(
            dimension_semantics=("parallel",),  # megacore sharding on v7x
        ),
    )(A_bf, W, C_f)

    return jnp.sum(partials)


def _reference(A_batch, X, B, C_batch):
    logits = A_batch @ X @ B
    z = -C_batch * logits
    return jnp.sum(jnp.maximum(z, 0.0) + jnp.log1p(jnp.exp(-jnp.abs(z))))


if __name__ == "__main__":
    # Small shapes consistent with the module: X is (m, n); A_batch is a batch
    # of row vectors, B projects to q outputs, C_batch are +/-1 labels.
    m, n = 32, 16
    q = 8

    key = jax.random.PRNGKey(0)
    k_x, k_a, k_b, k_c = jax.random.split(key, 4)

    X = jax.random.uniform(k_x, (m, n), jnp.float32, minval=-1.0, maxval=1.0)
    B = jax.random.normal(k_b, (n, q), jnp.float32)

    # --- case 1: small batch, single tile ---------------------------------
    batch = 8
    A_batch = jax.random.normal(k_a, (batch, m), jnp.float32)
    C_batch = jnp.sign(jax.random.normal(k_c, (batch, q), jnp.float32)) + 0.0

    loss = jax.block_until_ready(
        matrix_logistic_regression(A_batch, X, B, C_batch)
    )
    ref = jax.block_until_ready(_reference(A_batch, X, B, C_batch))
    # bf16 MXU inputs (f32 accumulation) -> relaxed tolerance vs f32 reference.
    assert jnp.allclose(loss, ref, rtol=2e-2, atol=1e-1), (loss, ref)

    # --- case 2: force multi-tile grid with a ragged last tile -------------
    batch2 = 20
    k_a2, k_c2 = jax.random.split(k_c)
    A2 = jax.random.normal(k_a2, (batch2, m), jnp.float32)
    C2 = jnp.sign(jax.random.normal(k_c2, (batch2, q), jnp.float32)) + 0.0

    loss2 = jax.block_until_ready(
        matrix_logistic_regression(A2, X, B, C2, tile_batch=8)
    )
    ref2 = jax.block_until_ready(_reference(A2, X, B, C2))
    assert jnp.allclose(loss2, ref2, rtol=2e-2, atol=1e-1), (loss2, ref2)

    print("KERNEL_OK")
</pallas_src>

<mosaic_0001>
module attributes {stable_mosaic.version = 11 : i64} {
  func.func @_mat_logreg_kernel(%arg0: i32, %arg1: memref<8x32xbf16, #tpu.memory_space<vmem>>, %arg2: memref<32x8xbf16, #tpu.memory_space<vmem>>, %arg3: memref<8x8xf32, #tpu.memory_space<vmem>>, %arg4: memref<1x8xf32, #tpu.memory_space<vmem>>) attributes {dimension_semantics = [#tpu.dimension_semantics<parallel>], iteration_bounds = array<i64: 1>, scalar_prefetch = 0 : i64, scratch_operands = 0 : i64, tpu.core_type = #tpu.core_type<tc>, window_params = [{transform_indices = @transform_0, window_bounds = array<i64: 8, 32>}, {pipeline_mode = #tpu.pipeline_mode<synchronous>, transform_indices = @transform_1, window_bounds = array<i64: 32, 8>}, {transform_indices = @transform_2, window_bounds = array<i64: 8, 8>}, {transform_indices = @transform_3, window_bounds = array<i64: 1, 8>}]} {
    %c0 = arith.constant 0 : index
    %c0_0 = arith.constant 0 : index
    %0 = vector.load %arg1[%c0, %c0_0] : memref<8x32xbf16, #tpu.memory_space<vmem>>, vector<8x32xbf16>
    %c0_1 = arith.constant 0 : index
    %c0_2 = arith.constant 0 : index
    %1 = vector.load %arg2[%c0_1, %c0_2] : memref<32x8xbf16, #tpu.memory_space<vmem>>, vector<32x8xbf16>
    %cst = arith.constant dense<0.000000e+00> : vector<8x8xf32>
    %2 = tpu.matmul %0, %1, %cst {dimension_numbers = #tpu.dot_dimension_numbers<[1], [0], [0], [1], [0, 0, 1, 1], [], []>} : vector<8x32xbf16>, vector<32x8xbf16>, vector<8x8xf32> -> vector<8x8xf32>
    %c0_3 = arith.constant 0 : index
    %c0_4 = arith.constant 0 : index
    %3 = vector.load %arg3[%c0_3, %c0_4] : memref<8x8xf32, #tpu.memory_space<vmem>>, vector<8x8xf32>
    %cst_5 = arith.constant 0.000000e+00 : f32
    %4 = vector.broadcast %cst_5 : f32 to vector<8x8xf32>
    %5 = arith.subf %4, %3 : vector<8x8xf32>
    %6 = arith.mulf %5, %2 : vector<8x8xf32>
    %cst_6 = arith.constant 0.000000e+00 : f32
    %7 = vector.broadcast %cst_6 : f32 to vector<8x8xf32>
    %8 = arith.maximumf %6, %7 : vector<8x8xf32>
    %9 = math.absf %6 : vector<8x8xf32>
    %cst_7 = arith.constant 0.000000e+00 : f32
    %10 = vector.broadcast %cst_7 : f32 to vector<8x8xf32>
    %11 = arith.subf %10, %9 : vector<8x8xf32>
    %12 = math.exp %11 : vector<8x8xf32>
    %13 = math.log1p %12 : vector<8x8xf32>
    %14 = arith.addf %8, %13 : vector<8x8xf32>
    %cst_8 = arith.constant dense<0.000000e+00> : vector<8xf32>
    %15 = vector.multi_reduction <add>, %14, %cst_8 [0] : vector<8x8xf32> to vector<8xf32>
    %16 = vector.shape_cast %15 : vector<8xf32> to vector<1x8xf32>
    %c0_9 = arith.constant 0 : index
    %c0_10 = arith.constant 0 : index
    %17 = vector.load %arg4[%c0_9, %c0_10] : memref<1x8xf32, #tpu.memory_space<vmem>>, vector<1x8xf32>
    tpu.vector_store %arg4[%c0_9, %c0_10], %16 {strides = array<i32>} : memref<1x8xf32, #tpu.memory_space<vmem>>, vector<1x8xf32>,
    return
  }
  func.func @transform_0(%arg0: i32) -> (i32, i32) {
    %c0_i32 = arith.constant 0 : i32
    %c0_i32_0 = arith.constant 0 : i32
    return %arg0, %c0_i32 : i32, i32
  }
  func.func @transform_1(%arg0: i32) -> (i32, i32) {
    %c0_i32 = arith.constant 0 : i32
    %c0_i32_0 = arith.constant 0 : i32
    %c0_i32_1 = arith.constant 0 : i32
    return %c0_i32, %c0_i32_0 : i32, i32
  }
  func.func @transform_2(%arg0: i32) -> (i32, i32) {
    %c0_i32 = arith.constant 0 : i32
    %c0_i32_0 = arith.constant 0 : i32
    return %arg0, %c0_i32 : i32, i32
  }
  func.func @transform_3(%arg0: i32) -> (i32, i32) {
    %c0_i32 = arith.constant 0 : i32
    %c0_i32_0 = arith.constant 0 : i32
    return %arg0, %c0_i32 : i32, i32
  }
}

</mosaic_0001>

<bundles_post_ra>
// kernel: tpu_custom_call.1
= control target key start
LH: loop header
LB: loop body
LE: loop exit
PB: predicated region body
PF: predicated region fallthrough
CT: control target
= control target key end

     0   :  { %v164_v1 = vmov 0.0   ;;  %vm165_vm0 = vmmov 0   ;;  %s202_s0 = inlined_call_operand.vmem [shape: bf16[8,32], index: 0, kind: input, shape index: {}]   ;;  %s203_s1 = inlined_call_operand.vmem [shape: bf16[32,8], index: 1, kind: input, shape index: {}]   ;;  %s204_s2 = inlined_call_operand.vmem [shape: f32[8,8], index: 2, kind: input, shape index: {}]   ;;  %s205_s3 = inlined_call_operand.hbm [shape: f32[1,8], index: 3, kind: output, shape index: {}]  }
   0x1   :  { %v136_v0 = vld [vmem:[%s203_s1 + $0x8] sm:$0xff]   ;;  %125 = vmatprep.subr.bf16.mxu0 %v164_v1  ;;  %v137_v2 = vld [vmem:[%s203_s1] sm:$0xff]   ;;  %129 = vmatprep.mubr.msk.bf16.mxu0 %vm165_vm0, %v164_v1 }
   0x2   :  { %126 = vmatpush3.bf16.msra.mxu0 %v136_v0 }
   0x3   :  { %8 = vsyncpa [#allocation3], 0  ;;  %127 = vmatprep.subr.bf16.mxu0 %v164_v1  ;;  %v16_v3 = vld [vmem:[%s202_s0] sm:$0xf]  ;;  %vm33_vm1 = vcmask 261120   ;;  %vm95_vm3 = vcmask 64512  }
   0x4   :  { %v77_v4 = vld [vmem:[%s204_s2] sm:$0xff]  ;;  %s166_s0 = smov [#allocation2]   ;;  %vm103_vm4 = vcmask 57344  }
   0x5   :  { %v78_v5 = vsub.f32 0.0, %v77_v4  ;;  %s111_s1 = sshll.u32 %s166_s0, 4  ;;  %s112_s1 = int_to_ptr.vmem [resolvable:$true] %s111_s1 }
   0x6   :  { %128 = vmatpush3.bf16.msra.mxu0 %v137_v2  ;;  %s142_s2 = scalar_lea.vmem %s112_s1, 16  ;;  %s146_s20 = scalar_lea.vmem %s112_s1, 32 }
   0x7   :  { %p143_p0 = scmp.ne.s32.totalorder %s112_s1, %s142_s2  ;;  %p147_p1 = scmp.lt.s32.totalorder %s112_s1, %s112_s1 }
   0x8   :  { %p148_p2 = scmp.lt.s32.totalorder %s146_s20, %s142_s2 }
   0x9   :  { %130 = vmatmul.mubr.msk.bf16.vlgmr.msra.gmra.mxu0 %vm33_vm1, %v16_v3 }
   0xa   :  { %p149_p3 = por %p148_p2, %p147_p1 }
   0xc   :  { %p150_p4 = pnand %p149_p3, %p143_p0 }
  0xc9   :  { %v71_v6 = vpop.f32.mrf.mxu0 }
  0xca   :  { %v79_v7 = vmul.f32 %v78_v5, %v71_v6 }
  0xcb   :  { %v131_v8 = vpop.f32.mrf.mxu0 }
  0xcc   :  { %v81_v9 = vand.u32 2147483647, %v79_v7  ;;  %v80_v22 = vmax.f32 %v79_v7, 0.0 }
  0xcd   :  { %v74_v10 = vpop.f32.mrf.mxu0 }
  0xce   :  { %v82_v11 = vsub.f32 0.0, %v81_v9 }
  0xcf   :  { %v132_v12 = vpop.f32.mrf.mxu0 }
  0xd0   :  { %v83_v13 = vmul.f32 1.442695, %v82_v11 }
  0xd2   :  { %138 = vpow2.f32 %v83_v13 }
  0xdf   :  { %v139_v14 = vpop.eup %138 }
  0xe0   :  { %v85_v15 = vadd.f32 1.0, %v139_v14  ;;  %v88_v16 = vmul.f32 -0.5, %v139_v14  ;;  %v91_v18 = vand.u32 2147483647, %v139_v14 }
  0xe2   :  { %140 = vlog2.f32 %v85_v15  ;;  %v89_v17 = vadd.f32 1.0, %v88_v16  ;;  %vm92_vm2 = vcmp.lt.f32.partialorder %v91_v18, 0.0004427343 }
  0xe4   :  { %v90_v21 = vmul.f32 %v139_v14, %v89_v17 }
  0xef   :  { %v141_v19 = vpop.eup %140 }
  0xf0   :  { %v87_v20 = vmul.f32 0.6931472, %v141_v19 }
  0xf2   :  { %v93_v23 = vsel %vm92_vm2, %v90_v21, %v87_v20 }
  0xf3   :  { %v94_v24 = vadd.f32 %v93_v23, %v80_v22 }
  0xf5   :  { %v96_v25 = vsel %vm95_vm3, %v94_v24, 0.0 }
  0xf6   :  { %v97_v26 = vrot.slane %v96_v25, 4 }
  0xf8   :  { %v98_v27 = vadd.f32 %v97_v26, %v96_v25 }
  0xfa   :  { %v99_v28 = vrot.slane %v98_v27, 2 }
  0xfc   :  { %v100_v29 = vadd.f32 %v99_v28, %v98_v27 }
  0xfe   :  { %v101_v30 = vrot.slane %v100_v29, 1 }
 0x100   :  { %v102_v31 = vadd.f32 %v101_v30, %v100_v29 }
 0x102   :  { %104 = vst.msk [vmem:[#allocation2] sm:$0x1] %vm103_vm4, %v102_v31 }
 0x103   :  { %153 = shalt.err (!%p150_p4)
}
 0x104   :  { %114 = dma.vmem_to_hbm [thread:$0]  %s112_s1, 16, %s205_s3, [#allocation3]  }
 0x105   :  { %162 = dma.done.wait [#allocation3], 16  }
 0x106   :  { %163 = vsyncadd [#allocation3], 4294967280 }
 0x107   :  { %118 = vsyncpa [#allocation3], 1 }

</bundles_post_ra>
